<compile_context>
chip_gen: v5e
topology: v5e:2x2
jax: 0.10.0
libtpu: 0.0.40
codegen_flags: <defaults>
</compile_context>

<pallas_src>
import math

import jax
import jax.numpy as jnp
from jax.experimental import pallas as pl
from jax.experimental.pallas import tpu as pltpu


_INV_SQRT2 = 1.0 / math.sqrt(2.0)


def _gelu_exact(x):
    # nn.GELU() default = exact erf-based GELU (done in f32).
    return 0.5 * x * (1.0 + jax.lax.erf(x * _INV_SQRT2))


def _round_up(a, b):
    return (a + b - 1) // b * b


def _choose_th(h_pad, d_pad, itemsize, budget=32 * 1024 * 1024):
    """Largest hidden tile (multiple of 128, divisor of h_pad) fitting budget."""
    if 2 * d_pad * h_pad * itemsize <= budget:          # single-buffered full H
        return h_pad
    for th in range(h_pad - 128, 0, -128):              # double-buffered tiles
        if h_pad % th == 0 and 4 * d_pad * th * itemsize <= budget:
            return th
    return 128


def mlp_kernel(x_ref, w1_ref, b1_ref, w2_ref, b2_ref, o_ref, acc_ref):
    hj = pl.program_id(1)

    @pl.when(hj == 0)
    def _():
        acc_ref[...] = jnp.zeros_like(acc_ref)

    # fc1 (a slice of hidden columns): native-dtype operands, f32 MXU accumulation.
    h = jnp.dot(x_ref[...], w1_ref[...], preferred_element_type=jnp.float32)
    h = _gelu_exact(h + b1_ref[...].astype(jnp.float32))

    # fc2 partial sum over the hidden axis.  dropout(p=0.0) is the identity.
    acc_ref[...] += jnp.dot(h.astype(w2_ref.dtype), w2_ref[...],
                            preferred_element_type=jnp.float32)

    @pl.when(hj == pl.num_programs(1) - 1)
    def _():
        o_ref[...] = (acc_ref[...] + b2_ref[...].astype(jnp.float32)).astype(o_ref.dtype)


def mlp_pallas(x2d, w1, b1, w2, b2, *, tm, th):
    """x2d: (M, D); w1: (D, H); b1: (1, H); w2: (H, D); b2: (1, D). Pre-padded."""
    M, D = x2d.shape
    H = w1.shape[1]
    assert M % tm == 0 and H % th == 0 and D % 128 == 0 and tm % 8 == 0

    nh = H // th
    grid = (M // tm, nh)

    # Grid-invariant operands do not need a second pipeline buffer.
    single = pl.Buffered(1)
    w_mode = single if nh == 1 else None

    def spec(shape, index_map, mode=None):
        if mode is None:
            return pl.BlockSpec(shape, index_map)
        return pl.BlockSpec(shape, index_map, pipeline_mode=mode)

    in_specs = [
        pl.BlockSpec((tm, D), lambda i, j: (i, 0)),   # x row tile
        spec((D, th), lambda i, j: (0, j), w_mode),   # W1 hidden slice
        spec((1, th), lambda i, j: (0, j), w_mode),   # b1 hidden slice
        spec((th, D), lambda i, j: (j, 0), w_mode),   # W2 hidden slice
        spec((1, D), lambda i, j: (0, 0), single),    # b2 (grid-invariant)
    ]

    itemsize = jnp.dtype(x2d.dtype).itemsize
    nbuf_w = 1 if nh == 1 else 2
    vmem_bytes = (
        2 * tm * D * itemsize                          # x (double-buffered)
        + nbuf_w * (D * th + th * D + th) * itemsize   # W1, W2, b1
        + D * itemsize                                 # b2
        + 2 * tm * D * itemsize                        # output (double-buffered)
        + tm * D * 4                                   # f32 accumulator scratch
    )
    vmem_limit = min(int(vmem_bytes * 1.4) + (2 << 20), 64 * 1024 * 1024)

    cost = pl.CostEstimate(
        flops=4 * M * D * H,            # two M x D x H matmuls
        transcendentals=M * H,          # erf in GELU
        bytes_accessed=(2 * M * D + 2 * D * H + H + D) * itemsize,
    )

    return pl.pallas_call(
        mlp_kernel,
        out_shape=jax.ShapeDtypeStruct((M, D), x2d.dtype),
        grid_spec=pltpu.PrefetchScalarGridSpec(
            num_scalar_prefetch=0,
            grid=grid,
            in_specs=in_specs,
            out_specs=pl.BlockSpec((tm, D), lambda i, j: (i, 0)),
            scratch_shapes=[pltpu.VMEM((tm, D), jnp.float32)],
        ),
        compiler_params=pltpu.CompilerParams(
            dimension_semantics=("parallel", "arbitrary"),
            vmem_limit_bytes=vmem_limit,
        ),
        cost_estimate=cost,
    )(x2d, w1, b1, w2, b2)


def mlp_forward(x, params, *, tm=256, th=None):
    """x: (batch, seq, in_features) -> same shape, matching PyTorch Mlp.forward."""
    w1, b1, w2, b2 = params
    B, N, D = x.shape
    H = w1.shape[1]
    itemsize = jnp.dtype(x.dtype).itemsize

    M = B * N
    # Lane-dense feature dims; zero padding is exact for fc1 -> GELU -> fc2.
    D_pad = _round_up(D, 128)
    H_pad = _round_up(H, 128)

    # Row tile: multiple of 8, capped by the (padded) row count.
    tm = max(8, _round_up(min(tm, _round_up(M, 8)), 8))
    M_pad = _round_up(M, tm)
    # Keep >= 2 steps on the parallel axis when possible (v7x megacore).
    if M_pad // tm < 2 and tm >= 16:
        tm_half = max(8, _round_up(tm // 2, 8))
        if _round_up(M, tm_half) // tm_half >= 2:
            tm = tm_half
            M_pad = _round_up(M, tm)

    if th is None:
        th = _choose_th(H_pad, D_pad, itemsize)
    assert H_pad % th == 0 and th % 128 == 0

    x2d = jnp.pad(x.reshape(M, D), ((0, M_pad - M), (0, D_pad - D)))
    w1p = jnp.pad(w1, ((0, D_pad - D), (0, H_pad - H)))
    b1p = jnp.pad(b1.reshape(1, H), ((0, 0), (0, H_pad - H)))
    w2p = jnp.pad(w2, ((0, H_pad - H), (0, D_pad - D)))
    b2p = jnp.pad(b2.reshape(1, D), ((0, 0), (0, D_pad - D)))

    y2d = mlp_pallas(x2d, w1p, b1p, w2p, b2p, tm=tm, th=th)
    return y2d[:M, :D].reshape(B, N, D)


def init_mlp_params(key, in_features, hidden_features, dtype=jnp.float32):
    """Deterministic init mimicking nn.Linear default (uniform +/- 1/sqrt(fan_in))."""
    k1, k2, k3, k4 = jax.random.split(key, 4)
    bound1 = 1.0 / math.sqrt(in_features)
    bound2 = 1.0 / math.sqrt(hidden_features)
    # stored as (in, out) for the kernel (transpose of PyTorch's (out, in))
    w1 = jax.random.uniform(k1, (in_features, hidden_features), dtype, -bound1, bound1)
    b1 = jax.random.uniform(k2, (1, hidden_features), dtype, -bound1, bound1)
    w2 = jax.random.uniform(k3, (hidden_features, in_features), dtype, -bound2, bound2)
    b2 = jax.random.uniform(k4, (1, in_features), dtype, -bound2, bound2)
    return w1, b1, w2, b2


def mlp_reference(x, params):
    w1, b1, w2, b2 = params
    h = jnp.einsum("bnd,dh->bnh", x, w1) + b1[0]
    h = _gelu_exact(h)
    y = jnp.einsum("bnh,hd->bnd", h, w2) + b2[0]
    return y


if __name__ == "__main__":
    key = jax.random.PRNGKey(0)
    kx, kp, kx2, kp2 = jax.random.split(key, 4)

    # Small shape consistent with the module (tokens x features).
    batch, seq, in_features, hidden_features = 2, 8, 32, 64
    x = jax.random.normal(kx, (batch, seq, in_features), dtype=jnp.float32)
    params = init_mlp_params(kp, in_features, hidden_features)

    y = jax.block_until_ready(mlp_forward(x, params))
    y_ref = mlp_reference(x, params)
    assert y.shape == x.shape
    assert jnp.allclose(y, y_ref, atol=1e-4, rtol=1e-4), "mismatch (small shape)"

    # A second, still-quick check that exercises row tiling, hidden-dim tiling
    # and the f32 accumulator path (grid = (4, 2)).
    b2_, s2_, d2_, h2_ = 4, 128, 256, 512
    x2 = jax.random.normal(kx2, (b2_, s2_, d2_), dtype=jnp.float32)
    params2 = init_mlp_params(kp2, d2_, h2_)
    y2 = jax.block_until_ready(mlp_forward(x2, params2, tm=128, th=256))
    y2_ref = mlp_reference(x2, params2)
    assert jnp.allclose(y2, y2_ref, atol=1e-3, rtol=1e-3), "mismatch (tiled shape)"

    print("KERNEL_OK")
</pallas_src>

<mosaic_0001>
module attributes {stable_mosaic.version = 11 : i64} {
  func.func @mlp_kernel(%arg0: i32, %arg1: i32, %arg2: memref<8x128xf32, #tpu.memory_space<vmem>>, %arg3: memref<128x128xf32, #tpu.memory_space<vmem>>, %arg4: memref<1x128xf32, #tpu.memory_space<vmem>>, %arg5: memref<128x128xf32, #tpu.memory_space<vmem>>, %arg6: memref<1x128xf32, #tpu.memory_space<vmem>>, %arg7: memref<8x128xf32, #tpu.memory_space<vmem>>, %arg8: memref<8x128xf32, #tpu.memory_space<vmem>>) attributes {dimension_semantics = [#tpu.dimension_semantics<parallel>, #tpu.dimension_semantics<arbitrary>], iteration_bounds = array<i64: 2, 1>, scalar_prefetch = 0 : i64, scratch_operands = 1 : i64, tpu.core_type = #tpu.core_type<tc>, window_params = [{transform_indices = @transform_0, window_bounds = array<i64: 8, 128>}, {pipeline_mode = #tpu.pipeline_mode<synchronous>, transform_indices = @transform_1, window_bounds = array<i64: 128, 128>}, {pipeline_mode = #tpu.pipeline_mode<synchronous>, transform_indices = @transform_2, window_bounds = array<i64: 1, 128>}, {pipeline_mode = #tpu.pipeline_mode<synchronous>, transform_indices = @transform_3, window_bounds = array<i64: 128, 128>}, {pipeline_mode = #tpu.pipeline_mode<synchronous>, transform_indices = @transform_4, window_bounds = array<i64: 1, 128>}, {transform_indices = @transform_5, window_bounds = array<i64: 8, 128>}]} {
    %c0_i32 = arith.constant 0 : i32
    %0 = arith.cmpi eq, %arg1, %c0_i32 : i32
    %1 = arith.extui %0 : i1 to i32
    %c0_i32_0 = arith.constant 0 : i32
    %2 = arith.cmpi ne, %1, %c0_i32_0 : i32
    scf.if %2 {
      %cst_18 = arith.constant 0.000000e+00 : f32
      %25 = vector.broadcast %cst_18 : f32 to vector<8x128xf32>
      %c0_19 = arith.constant 0 : index
      %c0_20 = arith.constant 0 : index
      %26 = vector.load %arg8[%c0_19, %c0_20] : memref<8x128xf32, #tpu.memory_space<vmem>>, vector<8x128xf32>
      tpu.vector_store %arg8[%c0_19, %c0_20], %25 {strides = array<i32>} : memref<8x128xf32, #tpu.memory_space<vmem>>, vector<8x128xf32>,
    } else {
    }
    %c0 = arith.constant 0 : index
    %c0_1 = arith.constant 0 : index
    %3 = vector.load %arg2[%c0, %c0_1] : memref<8x128xf32, #tpu.memory_space<vmem>>, vector<8x128xf32>
    %c0_2 = arith.constant 0 : index
    %c0_3 = arith.constant 0 : index
    %4 = vector.load %arg3[%c0_2, %c0_3] : memref<128x128xf32, #tpu.memory_space<vmem>>, vector<128x128xf32>
    %cst = arith.constant dense<0.000000e+00> : vector<8x128xf32>
    %5 = tpu.matmul %3, %4, %cst {dimension_numbers = #tpu.dot_dimension_numbers<[1], [0], [0], [1], [0, 0, 1, 1], [], []>} : vector<8x128xf32>, vector<128x128xf32>, vector<8x128xf32> -> vector<8x128xf32>
    %c0_4 = arith.constant 0 : index
    %c0_5 = arith.constant 0 : index
    %6 = vector.load %arg4[%c0_4, %c0_5] : memref<1x128xf32, #tpu.memory_space<vmem>>, vector<1x128xf32>
    %7 = vector.broadcast %6 : vector<1x128xf32> to vector<8x128xf32>
    %8 = arith.addf %5, %7 : vector<8x128xf32>
    %cst_6 = arith.constant 5.000000e-01 : f32
    %9 = vector.broadcast %cst_6 : f32 to vector<8x128xf32>
    %10 = arith.mulf %9, %8 : vector<8x128xf32>
    %cst_7 = arith.constant 0.707106769 : f32
    %11 = vector.broadcast %cst_7 : f32 to vector<8x128xf32>
    %12 = arith.mulf %8, %11 : vector<8x128xf32>
    %13 = math.erf %12 : vector<8x128xf32>
    %cst_8 = arith.constant 1.000000e+00 : f32
    %14 = vector.broadcast %cst_8 : f32 to vector<8x128xf32>
    %15 = arith.addf %14, %13 : vector<8x128xf32>
    %16 = arith.mulf %10, %15 : vector<8x128xf32>
    %c0_9 = arith.constant 0 : index
    %c0_10 = arith.constant 0 : index
    %17 = vector.load %arg8[%c0_9, %c0_10] : memref<8x128xf32, #tpu.memory_space<vmem>>, vector<8x128xf32>
    %c0_11 = arith.constant 0 : index
    %c0_12 = arith.constant 0 : index
    %18 = vector.load %arg5[%c0_11, %c0_12] : memref<128x128xf32, #tpu.memory_space<vmem>>, vector<128x128xf32>
    %cst_13 = arith.constant dense<0.000000e+00> : vector<8x128xf32>
    %19 = tpu.matmul %16, %18, %cst_13 {dimension_numbers = #tpu.dot_dimension_numbers<[1], [0], [0], [1], [0, 0, 1, 1], [], []>} : vector<8x128xf32>, vector<128x128xf32>, vector<8x128xf32> -> vector<8x128xf32>
    %20 = arith.addf %17, %19 : vector<8x128xf32>
    %c0_14 = arith.constant 0 : index
    %c0_15 = arith.constant 0 : index
    %21 = vector.load %arg8[%c0_14, %c0_15] : memref<8x128xf32, #tpu.memory_space<vmem>>, vector<8x128xf32>
    tpu.vector_store %arg8[%c0_14, %c0_15], %20 {strides = array<i32>} : memref<8x128xf32, #tpu.memory_space<vmem>>, vector<8x128xf32>,
    %c0_i32_16 = arith.constant 0 : i32
    %22 = arith.cmpi eq, %arg1, %c0_i32_16 : i32
    %23 = arith.extui %22 : i1 to i32
    %c0_i32_17 = arith.constant 0 : i32
    %24 = arith.cmpi ne, %23, %c0_i32_17 : i32
    scf.if %24 {
      %c0_18 = arith.constant 0 : index
      %c0_19 = arith.constant 0 : index
      %25 = vector.load %arg8[%c0_18, %c0_19] : memref<8x128xf32, #tpu.memory_space<vmem>>, vector<8x128xf32>
      %c0_20 = arith.constant 0 : index
      %c0_21 = arith.constant 0 : index
      %26 = vector.load %arg6[%c0_20, %c0_21] : memref<1x128xf32, #tpu.memory_space<vmem>>, vector<1x128xf32>
      %27 = vector.broadcast %26 : vector<1x128xf32> to vector<8x128xf32>
      %28 = arith.addf %25, %27 : vector<8x128xf32>
      %c0_22 = arith.constant 0 : index
      %c0_23 = arith.constant 0 : index
      %29 = vector.load %arg7[%c0_22, %c0_23] : memref<8x128xf32, #tpu.memory_space<vmem>>, vector<8x128xf32>
      tpu.vector_store %arg7[%c0_22, %c0_23], %28 {strides = array<i32>} : memref<8x128xf32, #tpu.memory_space<vmem>>, vector<8x128xf32>,
    } else {
    }
    return
  }
  func.func @transform_0(%arg0: i32, %arg1: i32) -> (i32, i32) {
    %c0_i32 = arith.constant 0 : i32
    %c0_i32_0 = arith.constant 0 : i32
    return %arg0, %c0_i32 : i32, i32
  }
  func.func @transform_1(%arg0: i32, %arg1: i32) -> (i32, i32) {
    %c0_i32 = arith.constant 0 : i32
    %c0_i32_0 = arith.constant 0 : i32
    return %c0_i32, %arg1 : i32, i32
  }
  func.func @transform_2(%arg0: i32, %arg1: i32) -> (i32, i32) {
    %c0_i32 = arith.constant 0 : i32
    %c0_i32_0 = arith.constant 0 : i32
    return %c0_i32, %arg1 : i32, i32
  }
  func.func @transform_3(%arg0: i32, %arg1: i32) -> (i32, i32) {
    %c0_i32 = arith.constant 0 : i32
    %c0_i32_0 = arith.constant 0 : i32
    return %arg1, %c0_i32 : i32, i32
  }
  func.func @transform_4(%arg0: i32, %arg1: i32) -> (i32, i32) {
    %c0_i32 = arith.constant 0 : i32
    %c0_i32_0 = arith.constant 0 : i32
    %c0_i32_1 = arith.constant 0 : i32
    return %c0_i32, %c0_i32_0 : i32, i32
  }
  func.func @transform_5(%arg0: i32, %arg1: i32) -> (i32, i32) {
    %c0_i32 = arith.constant 0 : i32
    %c0_i32_0 = arith.constant 0 : i32
    return %arg0, %c0_i32 : i32, i32
  }
}

</mosaic_0001>

<bundles_post_ra>
// kernel: tpu_custom_call.1
= control target key start
LH: loop header
LB: loop body
LE: loop exit
PB: predicated region body
PF: predicated region fallthrough
CT: control target
= control target key end

     0   :  { %10 = vsyncpa [#allocation4], 0  ;;  %s1062_s0 = inlined_call_operand.hbm [shape: f32[16,128], index: 0, kind: input, shape index: {}]   ;;  %s1063_s1 = inlined_call_operand.hbm [shape: f32[128,128], index: 1, kind: input, shape index: {}]   ;;  %s1064_s2 = inlined_call_operand.vmem [shape: f32[1,128], index: 2, kind: input, shape index: {}]   ;;  %s1065_s3 = inlined_call_operand.hbm [shape: f32[128,128], index: 3, kind: input, shape index: {}]   ;;  %s1066_s4 = inlined_call_operand.vmem [shape: f32[1,128], index: 4, kind: input, shape index: {}]   ;;  %s1067_s5 = inlined_call_operand.hbm [shape: f32[16,128], index: 5, kind: output, shape index: {}]  }
   0x1   :  { %12 = vsyncpa [#allocation4 + $0x1], 0 }
   0x2   :  { %13 = vsyncpa [#allocation7], 0 }
   0x3   :  { %14 = vsyncpa [#allocation5], 0 }
   0x4   :  { %16 = vsyncpa [#allocation5 + $0x1], 0  ;;  %s905_s18 = smov 0   ;;  %s907_s19 = smov 0  }
   0x5   :  { %s909_s20 = smov 0   ;;  %s911_s21 = smov 0  }
   0x6   :  { %s913_s22 = smov 0   ;;  %s915_s23 = smov 0  }
   0x7 LB: > { %s585_s24 = sadd.s32 4294967295, %s869_s23   ;;  %p587_p0 = scmp.ge.s32.totalorder %s869_s23, 1  ;;  %s869_s23 = sphi %s915_s23, %s22_s23   ;;  %s865_s22 = sphi %s913_s22, %s1077_s22   ;;  %s861_s21 = sphi %s911_s21, %s1076_s21   ;;  %s857_s20 = sphi %s909_s20, %s1075_s20   ;;  %s853_s19 = sphi %s907_s19, %s1074_s19   ;;  %s849_s18 = sphi %s905_s18, %s1073_s18  }
   0x8   : > { %p939_p1 = scmp.eq.s32.totalorder %s585_s24, 0  ;;  %p190_p2 = scmp.lt.s32.totalorder %s869_s23, 3 }
   0x9   : > { %s203_s28 = sshll.u32 %s1063_s1, 4  ;;  %s871_s30 = smov [#allocation6]   ;;  %s204_s28 = int_to_ptr.hbm [resolvable:$true] %s203_s28 }
   0xa   : > { %p947_p3 = pnand %p587_p0, %p190_p2  ;;  %s205_s6 = sshll.u32 %s871_s30, 4  ;;  %s206_s6 = int_to_ptr.vmem [resolvable:$true] %s205_s6 }
   0xb   : > { %p591_p6 = scmp.ge.s32.totalorder %s869_s23, 2  ;;  %s226_s9 = sshll.u32 %s1065_s3, 4  ;;  %s227_s9 = int_to_ptr.hbm [resolvable:$true] %s226_s9 }
   0xc   : > { %p616_p4 = pneg %p947_p3  ;;  %s872_s10 = smov 128  }
   0xd   : > { %s873_s11 = smov 8   ;;  %s874_s12 = smov [#allocation8]  }
   0xe   : > { %p617_p5 = pnand %p616_p4, %p939_p1  ;;  %s228_s13 = sshll.u32 %s874_s12, 4  ;;  %s229_s13 = int_to_ptr.vmem [resolvable:$true] %s228_s13 }
   0xf   : > { %s34_s14 = sadd.s32 1, %s865_s22  ;;  %s586_s15 = sadd.s32 4294967294, %s869_s23  }
  0x10   : > { %619 = dma.hbm_to_vmem [thread:$0]  (!%p617_p5), %s204_s28, 2048, %s206_s6, [#allocation7], %s872_s10, %s872_s10, %s873_s11  }
  0x11   : > { %622 = dma.hbm_to_vmem [thread:$0]  (!%p617_p5), %s227_s9, 2048, %s229_s13, [#allocation7], %s872_s10, %s872_s10, %s873_s11  }
  0x12   : > { %p36_p7 = scmp.ge.s32.totalorder %s34_s14, 2  ;;  %s41_s16 = sadd.s32 1, %s857_s20 }
  0x13   : > { %p48_p8 = scmp.ne.s32.totalorder %s857_s20, %s853_s19  ;;  %p49_p9 = scmp.eq.s32.totalorder %s869_s23, 0 }
  0x14   : > { %s1079_s14 = smov (%p36_p7, %s34_s14), 0  ;;  %p54_p10 = scmp.ne.s32.totalorder %s853_s19, %s849_s18 }
  0x15   : > { %s38_s17 = ssub.s32 %s865_s22, %s1079_s14  ;;  %p177_p11 = scmp.eq.s32.totalorder %s585_s24, 1 }
  0x16   : > { %p39_p12 = scmp.eq.s32.totalorder %s38_s17, 0  ;;  %p975_p13 = por %p939_p1, %p54_p10 }
  0x17   : > { %p979_p0 = por %p177_p11, %p48_p8  ;;  %p183_p2 = scmp.eq.s32.totalorder %s586_s15, 1 }
  0x18   : > { %s984_s28 = scalar_select %p39_p12, %s857_s20, %s41_s16  }
  0x19   : > { %p50_p4 = por %p49_p9, %p48_p8  ;;  %p986_p5 = por %p183_p2, %p54_p10 }
  0x1a   : > { %s245_s6 = sand.u32 1, %s857_s20   ;;  %s593_s24 = sshll.u32 %s865_s22, 3 }
  0x1b   : > { %p633_p7 = scmp.lt.s32.totalorder %s869_s23, 2  ;;  %s592_s7 = sshll.u32 %s245_s6, 3 }
  0x1c   : > { %s253_s10 = scalar_lea.hbm %s1062_s0, %s593_s24  ;;  %s249_s12 = scalar_lea.vmem [#allocation3], %s592_s7 }
  0x1d   : > { %s255_s11 = sshll.u32 %s253_s10, 4  ;;  %s257_s13 = sshll.u32 %s249_s12, 4  ;;  %s256_s11 = int_to_ptr.hbm [resolvable:$true] %s255_s11  ;;  %s258_s13 = int_to_ptr.vmem [resolvable:$true] %s257_s13 }
  0x1e   : > { %p624_p11 = pnand %p633_p7, %p50_p4  ;;  %s246_s15 = scalar_lea.sflag [#allocation4], %s245_s6 }
  0x1f   : > { %266 = sbr.rel (%p947_p3) target bundleno = 381 (0x17d), region = 40  ;;  %s999_s16 = sand.u32 (!%p947_p3), 1, %s853_s19  }
  0x20   : > { %626 = dma.hbm_to_vmem [thread:$0]  (!%p624_p11), %s256_s11, 128, %s258_s13, %s246_s15  }
  0x21   : > { %s595_s17 = sshll.u32 (!%p947_p3), %s999_s16, 3  ;;  %s269_s24 = scalar_lea.sflag (!%p947_p3), [#allocation4], %s999_s16 }
  0x22   : > { %s1005_s7 = scalar_lea.vmem (!%p947_p3), [#allocation3], %s595_s17 }
  0x24   : > { %836 = dma.done.wait (%p975_p13), %s269_s24, 128  }
  0x25   : > { %838 = vsyncadd (%p975_p13), %s269_s24, 4294967168 }
  0x26   : > { %840 = dma.done.wait (%p939_p1), [#allocation7], 4096  }
  0x27   : > { %842 = vsyncadd (%p939_p1), [#allocation7], 4294963200  ;;  %v338_v0 = vld [vmem:[#allocation6 + $0x78] sm:$0xff]  ;;  %v337_v1 = vld [vmem:[#allocation6 + $0x70] sm:$0xff]  ;;  %s601_s26 = sshll.u32 %s861_s21, 3  ;;  %s312_s12 = scalar_lea.vmem [#allocation9], %s595_s17 }
  0x28   : > { %343 = vmatpush.msra.mxu0 %v338_v0  ;;  %v336_v2 = vld [vmem:[#allocation6 + $0x68] sm:$0xff]  ;;  %v335_v3 = vld [vmem:[#allocation6 + $0x60] sm:$0xff]  ;;  %v334_v4 = vld [vmem:[#allocation6 + $0x58] sm:$0xff]  ;;  %s467_s9 = scalar_lea.hbm %s1067_s5, %s601_s26  ;;  %s469_s13 = sshll.u32 %s312_s12, 4  ;;  %s470_s13 = int_to_ptr.vmem [resolvable:$true] %s469_s13 }
  0x29   : > { %v333_v5 = vld [vmem:[#allocation6 + $0x50] sm:$0xff]  ;;  %v332_v6 = vld [vmem:[#allocation6 + $0x48] sm:$0xff]  ;;  %v331_v7 = vld [vmem:[#allocation6 + $0x40] sm:$0xff]  ;;  %s471_s15 = sshll.u32 %s467_s9, 4  ;;  %s457_s24 = scalar_lea.sflag [#allocation5], %s999_s16  ;;  %s472_s15 = int_to_ptr.hbm [resolvable:$true] %s471_s15 }
  0x2a   : > { %344 = vmatpush.msra.mxu0 %v337_v1  ;;  %v330_v8 = vld [vmem:[#allocation6 + $0x38] sm:$0xff]  ;;  %v329_v9 = vld [vmem:[#allocation6 + $0x30] sm:$0xff]  ;;  %v328_v10 = vld [vmem:[#allocation6 + $0x28] sm:$0xff]  ;;  %s797_s21 = sshra.s32 %s472_s15, 4  ;;  %s803_s26 = scalar_lea.hbm %s1067_s5, 16  ;;  %s798_s21 = int_to_ptr.hbm [resolvable:$true] %s797_s21 }
  0x2b   : > { %v327_v11 = vld [vmem:[#allocation6 + $0x20] sm:$0xff]  ;;  %v326_v12 = vld [vmem:[#allocation6 + $0x18] sm:$0xff]  ;;  %v325_v13 = vld [vmem:[#allocation6 + $0x10] sm:$0xff]  ;;  %p804_p9 = scmp.lt.s32.totalorder %s798_s21, %s1067_s5 }
  0x2c   : > { %345 = vmatpush.msra.mxu0 %v336_v2  ;;  %v324_v14 = vld [vmem:[#allocation6 + $0x8] sm:$0xff]  ;;  %v323_v15 = vld [vmem:[#allocation6] sm:$0xff]  ;;  %v322_v16 = vld [vmem:[%s1005_s7] sm:$0xff]  ;;  %s799_s7 = scalar_lea.hbm %s798_s21, 8 }
  0x2d   : > { %v423_v17 = vld [vmem:[#allocation8 + $0x78] sm:$0xff]  ;;  %v422_v18 = vld [vmem:[#allocation8 + $0x70] sm:$0xff]  ;;  %v421_v19 = vld [vmem:[#allocation8 + $0x68] sm:$0xff]  ;;  %p800_p1 = scmp.ne.s32.totalorder %s798_s21, %s799_s7  ;;  %p805_p10 = scmp.lt.s32.totalorder %s803_s26, %s799_s7 }
  0x2e   : > { %346 = vmatpush.msra.mxu0 %v335_v3  ;;  %424 = vmatpush.msra.mxu1 %v423_v17  ;;  %v420_v20 = vld [vmem:[#allocation8 + $0x60] sm:$0xff]  ;;  %v689_v21 = vld [vmem:[%s1064_s2] ss:$0 sm:$0xff]  ;;  %v419_v22 = vld [vmem:[#allocation8 + $0x58] sm:$0xff] }
  0x2f   : > { %v418_v23 = vld [vmem:[#allocation8 + $0x50] sm:$0xff]  ;;  %v417_v25 = vld [vmem:[#allocation8 + $0x48] sm:$0xff]  ;;  %v416_v27 = vld [vmem:[#allocation8 + $0x40] sm:$0xff]  ;;  %p801_p3 = pnand %p800_p1, %p979_p0  ;;  %p806_p12 = por %p805_p10, %p804_p9 }
  0x30   : > { %347 = vmatpush.msra.mxu0 %v334_v4  ;;  %425 = vmatpush.msra.mxu1 %v422_v18  ;;  %v415_v29 = vld [vmem:[#allocation8 + $0x38] sm:$0xff]  ;;  %v414_v31 = vld [vmem:[#allocation8 + $0x30] sm:$0xff]  ;;  %v413_v33 = vld [vmem:[#allocation8 + $0x28] sm:$0xff] }
  0x31   : > { %v412_v36 = vld [vmem:[#allocation8 + $0x20] sm:$0xff]  ;;  %v411_v39 = vld [vmem:[#allocation8 + $0x18] sm:$0xff]  ;;  %v410_v42 = vld [vmem:[#allocation8 + $0x10] sm:$0xff]  ;;  %p802_p8 = pneg %p801_p3 }
  0x32   : > { %348 = vmatpush.msra.mxu0 %v333_v5  ;;  %426 = vmatpush.msra.mxu1 %v421_v19  ;;  %v409_v45 = vld [vmem:[#allocation8 + $0x8] sm:$0xff]  ;;  %v408_v47 = vld [vmem:[#allocation8] sm:$0xff] }
  0x33   : > { %p807_p13 = pnand %p806_p12, %p802_p8 }
  0x34   : > { %349 = vmatpush.msra.mxu0 %v332_v6  ;;  %427 = vmatpush.msra.mxu1 %v420_v20 }
  0x36   : > { %350 = vmatpush.msra.mxu0 %v331_v7  ;;  %428 = vmatpush.msra.mxu1 %v419_v22 }
  0x38   : > { %351 = vmatpush.msra.mxu0 %v330_v8  ;;  %429 = vmatpush.msra.mxu1 %v418_v23 }
  0x3a   : > { %352 = vmatpush.msra.mxu0 %v329_v9  ;;  %430 = vmatpush.msra.mxu1 %v417_v25 }
  0x3c   : > { %353 = vmatpush.msra.mxu0 %v328_v10  ;;  %431 = vmatpush.msra.mxu1 %v416_v27 }
  0x3e   : > { %354 = vmatpush.msra.mxu0 %v327_v11  ;;  %432 = vmatpush.msra.mxu1 %v415_v29  ;;  %v690_v11 = vld [vmem:[%s1066_s4] ss:$0 sm:$0xff] }
  0x40   : > { %355 = vmatpush.msra.mxu0 %v326_v12  ;;  %433 = vmatpush.msra.mxu1 %v414_v31 }
  0x42   : > { %356 = vmatpush.msra.mxu0 %v325_v13  ;;  %434 = vmatpush.msra.mxu1 %v413_v33 }
  0x44   : > { %357 = vmatpush.msra.mxu0 %v324_v14  ;;  %435 = vmatpush.msra.mxu1 %v412_v36 }
  0x46   : > { %358 = vmatpush.msra.mxu0 %v323_v15  ;;  %436 = vmatpush.msra.mxu1 %v411_v39 }
  0x47   : > { %359 = vmatmul.f32.vlgmr.msra.gmra.mxu0 %v322_v16 }
  0x48   : > { %437 = vmatpush.msra.mxu1 %v410_v42 }
  0x4a   : > { %438 = vmatpush.msra.mxu1 %v409_v45 }
  0x4c   : > { %439 = vmatpush.msra.mxu1 %v408_v47 }
  0xc4   : > { %v360_v24 = vpop.f32.mrf.mxu0 }
  0xc5   : > { %v361_v26 = vadd.f32 %v689_v21, %v360_v24 }
  0xc7   : > { %v364_v28 = vmul.f32 0.70710677, %v361_v26  ;;  %v363_v8 = vmul.f32 0.5, %v361_v26 }
  0xc9   : > { %v365_v30 = vmul.f32 %v364_v28, %v364_v28 }
  0xcb   : > { %v366_v32 = vmin.f32 %v365_v30, 16.0 }
  0xcd   : > { %v367_v34 = vmul.f32 2.1237322e-06, %v366_v32  ;;  %v378_v35 = vmul.f32 3.8918573e-05, %v366_v32 }
  0xcf   : > { %v368_v37 = vadd.f32 0.00028619796, %v367_v34  ;;  %v379_v38 = vadd.f32 0.001143296, %v378_v35 }
  0xd1   : > { %v369_v40 = vmul.f32 %v368_v37, %v366_v32  ;;  %v380_v41 = vmul.f32 %v379_v38, %v366_v32 }
  0xd3   : > { %v381_v43 = vadd.f32 0.014752088, %v380_v41  ;;  %v370_v44 = vadd.f32 0.0036580483, %v369_v40 }
  0xd5   : > { %v382_v46 = vmul.f32 %v381_v43, %v366_v32  ;;  %v371_v49 = vmul.f32 %v370_v44, %v366_v32 }
  0xd7   : > { %v383_v48 = vadd.f32 0.112945676, %v382_v46  ;;  %v372_v52 = vadd.f32 0.05243302, %v371_v49 }
  0xd9   : > { %v384_v50 = vmul.f32 %v383_v48, %v366_v32  ;;  %v373_v55 = vmul.f32 %v372_v52, %v366_v32 }
  0xdb   : > { %v385_v51 = vadd.f32 0.4994258, %v384_v50  ;;  %v374_v56 = vadd.f32 0.18741608, %v373_v55 }
  0xdd   : > { %v386_v53 = vmul.f32 %v385_v51, %v366_v32  ;;  %v375_v58 = vmul.f32 %v374_v56, %v366_v32 }
  0xdf   : > { %v387_v54 = vadd.f32 1.0, %v386_v53  ;;  %v376_v62 = vadd.f32 1.1283791, %v375_v58 }
  0xe1   : > { %691 = vrcp.f32 %v387_v54  ;;  %v399_v61 = vand.u32 2147483648, %v387_v54  ;;  %v397_v0 = vand.u32 2147483647, %v387_v54  ;;  %vm393_vm1 = vweird.f32 %v387_v54 }
  0xe2   : > { %v377_v3 = vmul.f32 %v376_v62, %v364_v28 }
  0xe3   : > { %v400_v2 = vor.u32 1.1754944e-38, %v399_v61  ;;  %vm398_vm3 = vcmp.eq.f32.partialorder %v397_v0, 8.507059e+37 }
  0xe7   : > { %v692_v57 = vpop.eup %691 }
  0xe8   : > { %v389_v59 = vmul.f32 %v692_v57, %v387_v54  ;;  %vm394_vm0 = vweird.f32 %v692_v57 }
  0xe9   : > { %vm395_vm2 = vmor %vm393_vm1, %vm394_vm0 }
  0xea   : > { %v390_v60 = vsub.f32 1.0, %v389_v59 }
  0xec   : > { %v391_v63 = vmul.f32 %v692_v57, %v390_v60 }
  0xee   : > { %v392_v1 = vadd.f32 %v692_v57, %v391_v63 }
  0xf0   : > { %v396_v4 = vsel %vm395_vm2, %v692_v57, %v392_v1 }
  0xf1   : > { %v401_v5 = vsel %vm398_vm3, %v400_v2, %v396_v4 }
  0xf2   : > { %v402_v6 = vmul.f32 %v401_v5, %v377_v3 }
  0xf4   : > { %v599_v7 = vclamps-f32 %v402_v6, 1.0 }
  0xf6   : > { %v405_v9 = vadd.f32 1.0, %v599_v7 }
  0xf8   : > { %v406_v10 = vmul.f32 %v405_v9, %v363_v8 }
  0xfa   : > { %440 = vmatmul.f32.vlgmr.msra.gmra.mxu1 %v406_v10 }
 0x177   : > { %v441_v12 = vpop.f32.mrf.mxu1 }
 0x178   : > { %v454_v13 = vadd.f32 %v690_v11, %v441_v12 }
 0x17a   : > { %455 = vst [vmem:[%s312_s12] sm:$0xff] %v454_v13 }
 0x17b   : > { %810 = shalt.err (!%p807_p13)
}
 0x17c   : > { %614 = dma.vmem_to_hbm [thread:$0]  (%p979_p0), %s470_s13, 128, %s472_s15, %s457_s24  }
 0x17d PF: > { %s483_s16 = sand.u32 1, %s849_s18   ;;  %p628_p2 = pnand %p591_p6, %p986_p5 }
 0x17e   : > { %s484_s8 = scalar_lea.sflag [#allocation5], %s483_s16 }
 0x17f   : > { %p629_p4 = pneg %p628_p2 }
 0x181   : > { %844 = dma.done.wait (%p629_p4), %s484_s8, 128  }
 0x182   : > { %846 = vsyncadd (%p629_p4), %s484_s8, 4294967168  ;;  %s22_s23 = sadd.s32 1, %s869_s23   ;;  %s1073_s18 = smov %s853_s19 }
 0x183   : > { %p19_p7 = scmp.ge.s32.totalorder %s22_s23, 4   ;;  %s1074_s19 = smov %s857_s20 }
 0x184   : > { %s1075_s20 = smov %s984_s28  ;;  %s1076_s21 = smov %s865_s22 }
 0x185   : > { %s1077_s22 = smov %s1079_s14  ;;  %21 = sbr.rel (!%p19_p7) target bundleno = 7 (0x7), region = 106 }
 0x18a   :  { %490 = vsyncpa [#allocation4], 1 }
 0x18b   :  { %492 = vsyncpa [#allocation4 + $0x1], 1 }
 0x18c   :  { %493 = vsyncpa [#allocation7], 1 }
 0x18d   :  { %494 = vsyncpa [#allocation5], 1 }
 0x18e   :  { %496 = vsyncpa [#allocation5 + $0x1], 1 }

</bundles_post_ra>
